<compile_context>
chip_gen: v5e
topology: v5e:2x2
jax: 0.10.0
libtpu: 0.0.40
codegen_flags: <defaults>
</compile_context>

<pallas_src>
import functools
import numpy as np
import jax
import jax.numpy as jnp
from jax.experimental import pallas as pl
from jax.experimental.pallas import tpu as pltpu


# ----------------------------------------------------------------------------
# Entmax-1.5 (exact, Peters et al. 2019).  Setup-time only: runs on the tiny
# (k, D) LearnableLocality parameter, never on the data hot path.
# ----------------------------------------------------------------------------
def _entmax15(z):
    z = z / 2.0
    z_sorted = -jnp.sort(-z, axis=-1)
    d = z.shape[-1]
    rho = jnp.arange(1, d + 1, dtype=z.dtype)
    mean = jnp.cumsum(z_sorted, axis=-1) / rho
    mean_sq = jnp.cumsum(z_sorted ** 2, axis=-1) / rho
    ss = rho * (mean_sq - mean ** 2)
    delta = (1.0 - ss) / rho
    tau = mean - jnp.sqrt(jnp.maximum(delta, 0.0))
    support_size = jnp.sum(tau <= z_sorted, axis=-1, keepdims=True)
    tau_star = jnp.take_along_axis(tau, support_size - 1, axis=-1)
    return jnp.maximum(z - tau_star, 0.0) ** 2


# ----------------------------------------------------------------------------
# Fully fused BasicBlock kernel:
#   conv1 -> conv2 (+ residual from downsample) -> leaky_relu, one grid step
#   per batch tile.  Each AbstractLayer = two wide matmuls (gate / value
#   blocks, mask+BN already folded into the weights) + GLU + relu-sum over k.
# ----------------------------------------------------------------------------
def _basic_block_kernel(pre_ref, x_ref,
                        wg1, wv1, bg1, bv1,      # conv1  (folded)
                        wg2, wv2, bg2, bv2,      # conv2  (folded)
                        wg3, wv3, bg3, bv3,      # downsample (folded)
                        o_ref, *, k, half_dim, out_dim, matmul_dtype):

    def abstract_layer(inp_f32, wg_ref, wv_ref, bg_ref, bv_ref, gdim):
        a = inp_f32.astype(matmul_dtype)
        gate = jnp.dot(a, wg_ref[...].astype(matmul_dtype),
                       preferred_element_type=jnp.float32) + bg_ref[...]
        val = jnp.dot(a, wv_ref[...].astype(matmul_dtype),
                      preferred_element_type=jnp.float32) + bv_ref[...]
        h = jnp.maximum(jax.nn.sigmoid(gate) * val, 0.0)      # (TB, k*gdim), f32
        # sum over the k groups (relu is per-group, so this reduce cannot be
        # folded into the matmul); k is small -> static unroll.
        acc = h[:, 0:gdim]
        for g in range(1, k):
            acc = acc + h[:, g * gdim:(g + 1) * gdim]
        return acc

    pre = pre_ref[...].astype(jnp.float32)
    x = x_ref[...].astype(jnp.float32)

    h1 = abstract_layer(pre, wg1, wv1, bg1, bv1, half_dim)     # conv1(pre_out)
    out2 = abstract_layer(h1, wg2, wv2, bg2, bv2, out_dim)     # conv2(.)
    # TODO(synk): Dropout in `downsample` is identity in inference mode (no RNG mask).
    ident = abstract_layer(x, wg3, wv3, bg3, bv3, out_dim)     # downsample(x)

    y = out2 + ident
    o_ref[...] = jnp.where(y >= 0.0, y, 0.01 * y).astype(o_ref.dtype)   # leaky_relu(0.01)


def _round_up(n, m):
    return ((n + m - 1) // m) * m


def basic_block_forward(params, x, pre_out=None, *, block_b=256,
                        matmul_dtype=jnp.float32):
    """Single fused pallas_call for the whole BasicBlock forward (inference)."""
    if pre_out is None:
        pre_out = x
    B = x.shape[0]
    p1, p2, p3 = params["conv1"], params["conv2"], params["down"]
    k = p1["k"]
    half_dim = p1["out_dim"]           # base_outdim // 2
    out_dim = p2["out_dim"]            # base_outdim
    in_dim = pre_out.shape[1]
    fix_dim = x.shape[1]

    # Batch tile: multiple of 8 sublanes; pad B so the grid divides evenly.
    tb = min(block_b, _round_up(B, 8))
    Bp = _round_up(B, tb)
    if Bp != B:
        pad = Bp - B
        pre_out = jnp.pad(pre_out, ((0, pad), (0, 0)))
        x = jnp.pad(x, ((0, pad), (0, 0)))

    weight_args = [p1["wg"], p1["wv"], p1["bg"], p1["bv"],
                   p2["wg"], p2["wv"], p2["bg"], p2["bv"],
                   p3["wg"], p3["wv"], p3["bg"], p3["bv"]]

    # VMEM budget: double-buffered activation tiles + resident folded weights
    # (+ headroom), capped below v7x's 64 MiB physical VMEM.
    param_bytes = sum(int(np.prod(a.shape)) * a.dtype.itemsize for a in weight_args)
    act_bytes = tb * (in_dim + fix_dim + out_dim) * 4
    vmem_limit = min(2 * (param_bytes + act_bytes) + (8 << 20), 64 << 20)

    def act_spec(d):
        return pl.BlockSpec((tb, d), lambda i: (i, 0))

    def const_spec(a):
        # whole array, VMEM-resident across all batch tiles
        return pl.BlockSpec(a.shape, lambda i: (0, 0))

    kernel = functools.partial(_basic_block_kernel, k=k, half_dim=half_dim,
                               out_dim=out_dim, matmul_dtype=matmul_dtype)

    out = pl.pallas_call(
        kernel,
        out_shape=jax.ShapeDtypeStruct((Bp, out_dim), jnp.float32),
        grid_spec=pltpu.PrefetchScalarGridSpec(
            num_scalar_prefetch=0,
            grid=(Bp // tb,),
            in_specs=[act_spec(in_dim), act_spec(fix_dim)]
                     + [const_spec(a) for a in weight_args],
            out_specs=act_spec(out_dim),
        ),
        compiler_params=pltpu.CompilerParams(
            dimension_semantics=("parallel",),      # v7x: shard batch over 2 TCs
            vmem_limit_bytes=int(vmem_limit),
        ),
    )(pre_out, x, *weight_args)
    return out[:B]


# ----------------------------------------------------------------------------
# Parameter construction (mirrors AbstractLayer.__init__ shapes), with the
# mask / conv-bias / BN folding done once at init time.
# ----------------------------------------------------------------------------
def init_abstract_layer(key, input_dim, output_dim, k):
    k1, k2, k3 = jax.random.split(key, 3)
    # LearnableLocality: weight ~ U[0,1), mask = Entmax15(weight)
    loc_w = jax.random.uniform(k1, (k, input_dim), dtype=jnp.float32)
    mask = _entmax15(loc_w)
    # Grouped Conv1d(k*D -> 2*k*out, ksize=1, groups=k): per-group (D, 2*out)
    gain = np.sqrt((input_dim * k + 2 * k * output_dim) / np.sqrt(input_dim * k))
    fan_in, fan_out = input_dim, 2 * k * output_dim
    std = gain * np.sqrt(2.0 / (fan_in + fan_out))              # xavier_normal_
    w = std * jax.random.normal(k2, (k, input_dim, 2 * output_dim), dtype=jnp.float32)
    bias = (1.0 / np.sqrt(input_dim)) * (
        2.0 * jax.random.uniform(k3, (k, 2 * output_dim), dtype=jnp.float32) - 1.0)
    # GBN inference mode (BatchNorm1d running stats): gamma=1, beta=0, mean=0, var=1
    eps = 1e-5
    gamma = jnp.ones((k, 2 * output_dim), jnp.float32)
    beta = jnp.zeros((k, 2 * output_dim), jnp.float32)
    running_mean = jnp.zeros((k, 2 * output_dim), jnp.float32)
    running_var = jnp.ones((k, 2 * output_dim), jnp.float32)
    bn_scale = gamma / jnp.sqrt(running_var + eps)
    scale = bn_scale                                            # (k, 2*out)
    shift = (bias - running_mean) * bn_scale + beta             # (k, 2*out)

    # Fold mask + BN scale into the weights; split gate/value halves and
    # concatenate the k groups along the output (lane) axis.
    w_f = mask[:, :, None] * w * scale[:, None, :]              # (k, D, 2*out)
    wg = jnp.concatenate([w_f[g, :, :output_dim] for g in range(k)], axis=1)   # (D, k*out)
    wv = jnp.concatenate([w_f[g, :, output_dim:] for g in range(k)], axis=1)   # (D, k*out)
    bg = jnp.concatenate([shift[g, :output_dim] for g in range(k)])[None, :]   # (1, k*out)
    bv = jnp.concatenate([shift[g, output_dim:] for g in range(k)])[None, :]   # (1, k*out)

    return dict(
        # folded params used by the fused kernel
        wg=wg, wv=wv, bg=bg, bv=bv, k=k, out_dim=output_dim,
        # raw params kept only for the pure-JAX reference check
        mask=mask, w=w, scale=scale, shift=shift,
    )


def init_basic_block(key, input_dim, base_outdim, k, fix_input_dim):
    k1, k2, k3 = jax.random.split(key, 3)
    return dict(
        conv1=init_abstract_layer(k1, input_dim, base_outdim // 2, k),
        conv2=init_abstract_layer(k2, base_outdim // 2, base_outdim, k),
        down=init_abstract_layer(k3, fix_input_dim, base_outdim, k),
    )


# ----------------------------------------------------------------------------
# Pure-JAX reference (unfolded math) for correctness checking
# ----------------------------------------------------------------------------
def _abstract_layer_ref(x, p):
    k, out_dim = p["k"], p["out_dim"]
    acc = jnp.zeros((x.shape[0], out_dim), jnp.float32)
    for g in range(k):
        h = (x * p["mask"][g]) @ p["w"][g]
        h = h * p["scale"][g] + p["shift"][g]
        acc = acc + jnp.maximum(jax.nn.sigmoid(h[:, :out_dim]) * h[:, out_dim:], 0.0)
    return acc


def _basic_block_ref(params, x, pre_out=None):
    if pre_out is None:
        pre_out = x
    out = _abstract_layer_ref(pre_out, params["conv1"])
    out = _abstract_layer_ref(out, params["conv2"])
    identity = _abstract_layer_ref(x, params["down"])
    out = out + identity
    return jnp.where(out >= 0.0, out, 0.01 * out)


if __name__ == "__main__":
    B = 48                               # not a multiple of the batch tile -> exercises padding
    input_dim = fix_input_dim = 8        # pre_out defaults to x, so they must match
    base_outdim = 16
    k = 3
    # virtual_batch_size / drop_rate only matter in training; inference path is
    # folded running-stats BN + identity dropout.

    key = jax.random.PRNGKey(0)
    pkey, xkey = jax.random.split(key)
    params = init_basic_block(pkey, input_dim, base_outdim, k, fix_input_dim)
    x = jax.random.normal(xkey, (B, input_dim), dtype=jnp.float32)

    ref = _basic_block_ref(params, x)

    # f32-matmul path (exact check; v5e-friendly default)
    out = basic_block_forward(params, x, block_b=32, matmul_dtype=jnp.float32)
    out = jax.block_until_ready(out)
    assert out.shape == (B, base_outdim)
    np.testing.assert_allclose(np.asarray(out), np.asarray(ref), rtol=1e-5, atol=1e-5)

    # bf16-matmul path (v6e/v7x MXU), f32 accumulation + f32 epilogue
    out_bf16 = basic_block_forward(params, x, block_b=32, matmul_dtype=jnp.bfloat16)
    out_bf16 = jax.block_until_ready(out_bf16)
    np.testing.assert_allclose(np.asarray(out_bf16), np.asarray(ref), rtol=5e-2, atol=5e-2)

    print("KERNEL_OK")
</pallas_src>

<mosaic_0001>
module attributes {stable_mosaic.version = 11 : i64} {
  func.func @_basic_block_kernel(%arg0: i32, %arg1: memref<32x8xf32, #tpu.memory_space<vmem>>, %arg2: memref<32x8xf32, #tpu.memory_space<vmem>>, %arg3: memref<8x24xf32, #tpu.memory_space<vmem>>, %arg4: memref<8x24xf32, #tpu.memory_space<vmem>>, %arg5: memref<1x24xf32, #tpu.memory_space<vmem>>, %arg6: memref<1x24xf32, #tpu.memory_space<vmem>>, %arg7: memref<8x48xf32, #tpu.memory_space<vmem>>, %arg8: memref<8x48xf32, #tpu.memory_space<vmem>>, %arg9: memref<1x48xf32, #tpu.memory_space<vmem>>, %arg10: memref<1x48xf32, #tpu.memory_space<vmem>>, %arg11: memref<8x48xf32, #tpu.memory_space<vmem>>, %arg12: memref<8x48xf32, #tpu.memory_space<vmem>>, %arg13: memref<1x48xf32, #tpu.memory_space<vmem>>, %arg14: memref<1x48xf32, #tpu.memory_space<vmem>>, %arg15: memref<32x16xf32, #tpu.memory_space<vmem>>) attributes {dimension_semantics = [#tpu.dimension_semantics<parallel>], iteration_bounds = array<i64: 2>, scalar_prefetch = 0 : i64, scratch_operands = 0 : i64, tpu.core_type = #tpu.core_type<tc>, window_params = [{transform_indices = @transform_0, window_bounds = array<i64: 32, 8>}, {transform_indices = @transform_1, window_bounds = array<i64: 32, 8>}, {pipeline_mode = #tpu.pipeline_mode<synchronous>, transform_indices = @transform_2, window_bounds = array<i64: 8, 24>}, {pipeline_mode = #tpu.pipeline_mode<synchronous>, transform_indices = @transform_3, window_bounds = array<i64: 8, 24>}, {pipeline_mode = #tpu.pipeline_mode<synchronous>, transform_indices = @transform_4, window_bounds = array<i64: 1, 24>}, {pipeline_mode = #tpu.pipeline_mode<synchronous>, transform_indices = @transform_5, window_bounds = array<i64: 1, 24>}, {pipeline_mode = #tpu.pipeline_mode<synchronous>, transform_indices = @transform_6, window_bounds = array<i64: 8, 48>}, {pipeline_mode = #tpu.pipeline_mode<synchronous>, transform_indices = @transform_7, window_bounds = array<i64: 8, 48>}, {pipeline_mode = #tpu.pipeline_mode<synchronous>, transform_indices = @transform_8, window_bounds = array<i64: 1, 48>}, {pipeline_mode = #tpu.pipeline_mode<synchronous>, transform_indices = @transform_9, window_bounds = array<i64: 1, 48>}, {pipeline_mode = #tpu.pipeline_mode<synchronous>, transform_indices = @transform_10, window_bounds = array<i64: 8, 48>}, {pipeline_mode = #tpu.pipeline_mode<synchronous>, transform_indices = @transform_11, window_bounds = array<i64: 8, 48>}, {pipeline_mode = #tpu.pipeline_mode<synchronous>, transform_indices = @transform_12, window_bounds = array<i64: 1, 48>}, {pipeline_mode = #tpu.pipeline_mode<synchronous>, transform_indices = @transform_13, window_bounds = array<i64: 1, 48>}, {transform_indices = @transform_14, window_bounds = array<i64: 32, 16>}]} {
    %c0 = arith.constant 0 : index
    %c0_0 = arith.constant 0 : index
    %0 = vector.load %arg1[%c0, %c0_0] : memref<32x8xf32, #tpu.memory_space<vmem>>, vector<32x8xf32>
    %c0_1 = arith.constant 0 : index
    %c0_2 = arith.constant 0 : index
    %1 = vector.load %arg2[%c0_1, %c0_2] : memref<32x8xf32, #tpu.memory_space<vmem>>, vector<32x8xf32>
    %c0_3 = arith.constant 0 : index
    %c0_4 = arith.constant 0 : index
    %2 = vector.load %arg3[%c0_3, %c0_4] : memref<8x24xf32, #tpu.memory_space<vmem>>, vector<8x24xf32>
    %cst = arith.constant dense<0.000000e+00> : vector<32x24xf32>
    %3 = tpu.matmul %0, %2, %cst {dimension_numbers = #tpu.dot_dimension_numbers<[1], [0], [0], [1], [0, 0, 1, 1], [], []>} : vector<32x8xf32>, vector<8x24xf32>, vector<32x24xf32> -> vector<32x24xf32>
    %c0_5 = arith.constant 0 : index
    %c0_6 = arith.constant 0 : index
    %4 = vector.load %arg5[%c0_5, %c0_6] : memref<1x24xf32, #tpu.memory_space<vmem>>, vector<1x24xf32>
    %5 = vector.broadcast %4 : vector<1x24xf32> to vector<32x24xf32>
    %6 = arith.addf %3, %5 : vector<32x24xf32>
    %c0_7 = arith.constant 0 : index
    %c0_8 = arith.constant 0 : index
    %7 = vector.load %arg4[%c0_7, %c0_8] : memref<8x24xf32, #tpu.memory_space<vmem>>, vector<8x24xf32>
    %cst_9 = arith.constant dense<0.000000e+00> : vector<32x24xf32>
    %8 = tpu.matmul %0, %7, %cst_9 {dimension_numbers = #tpu.dot_dimension_numbers<[1], [0], [0], [1], [0, 0, 1, 1], [], []>} : vector<32x8xf32>, vector<8x24xf32>, vector<32x24xf32> -> vector<32x24xf32>
    %c0_10 = arith.constant 0 : index
    %c0_11 = arith.constant 0 : index
    %9 = vector.load %arg6[%c0_10, %c0_11] : memref<1x24xf32, #tpu.memory_space<vmem>>, vector<1x24xf32>
    %10 = vector.broadcast %9 : vector<1x24xf32> to vector<32x24xf32>
    %11 = arith.addf %8, %10 : vector<32x24xf32>
    %12 = arith.negf %6 : vector<32x24xf32>
    %13 = math.exp %12 : vector<32x24xf32>
    %cst_12 = arith.constant 1.000000e+00 : f32
    %14 = vector.broadcast %cst_12 : f32 to vector<32x24xf32>
    %15 = arith.addf %14, %13 : vector<32x24xf32>
    %16 = arith.divf %14, %15 : vector<32x24xf32>
    %17 = arith.mulf %16, %11 : vector<32x24xf32>
    %cst_13 = arith.constant 0.000000e+00 : f32
    %18 = vector.broadcast %cst_13 : f32 to vector<32x24xf32>
    %19 = arith.maximumf %17, %18 : vector<32x24xf32>
    %20 = vector.extract_strided_slice %19 {offsets = [0, 0], sizes = [32, 8], strides = [1, 1]} : vector<32x24xf32> to vector<32x8xf32>
    %21 = vector.extract_strided_slice %19 {offsets = [0, 8], sizes = [32, 8], strides = [1, 1]} : vector<32x24xf32> to vector<32x8xf32>
    %22 = arith.addf %20, %21 : vector<32x8xf32>
    %23 = vector.extract_strided_slice %19 {offsets = [0, 16], sizes = [32, 8], strides = [1, 1]} : vector<32x24xf32> to vector<32x8xf32>
    %24 = arith.addf %22, %23 : vector<32x8xf32>
    %c0_14 = arith.constant 0 : index
    %c0_15 = arith.constant 0 : index
    %25 = vector.load %arg7[%c0_14, %c0_15] : memref<8x48xf32, #tpu.memory_space<vmem>>, vector<8x48xf32>
    %cst_16 = arith.constant dense<0.000000e+00> : vector<32x48xf32>
    %26 = tpu.matmul %24, %25, %cst_16 {dimension_numbers = #tpu.dot_dimension_numbers<[1], [0], [0], [1], [0, 0, 1, 1], [], []>} : vector<32x8xf32>, vector<8x48xf32>, vector<32x48xf32> -> vector<32x48xf32>
    %c0_17 = arith.constant 0 : index
    %c0_18 = arith.constant 0 : index
    %27 = vector.load %arg9[%c0_17, %c0_18] : memref<1x48xf32, #tpu.memory_space<vmem>>, vector<1x48xf32>
    %28 = vector.broadcast %27 : vector<1x48xf32> to vector<32x48xf32>
    %29 = arith.addf %26, %28 : vector<32x48xf32>
    %c0_19 = arith.constant 0 : index
    %c0_20 = arith.constant 0 : index
    %30 = vector.load %arg8[%c0_19, %c0_20] : memref<8x48xf32, #tpu.memory_space<vmem>>, vector<8x48xf32>
    %cst_21 = arith.constant dense<0.000000e+00> : vector<32x48xf32>
    %31 = tpu.matmul %24, %30, %cst_21 {dimension_numbers = #tpu.dot_dimension_numbers<[1], [0], [0], [1], [0, 0, 1, 1], [], []>} : vector<32x8xf32>, vector<8x48xf32>, vector<32x48xf32> -> vector<32x48xf32>
    %c0_22 = arith.constant 0 : index
    %c0_23 = arith.constant 0 : index
    %32 = vector.load %arg10[%c0_22, %c0_23] : memref<1x48xf32, #tpu.memory_space<vmem>>, vector<1x48xf32>
    %33 = vector.broadcast %32 : vector<1x48xf32> to vector<32x48xf32>
    %34 = arith.addf %31, %33 : vector<32x48xf32>
    %35 = arith.negf %29 : vector<32x48xf32>
    %36 = math.exp %35 : vector<32x48xf32>
    %cst_24 = arith.constant 1.000000e+00 : f32
    %37 = vector.broadcast %cst_24 : f32 to vector<32x48xf32>
    %38 = arith.addf %37, %36 : vector<32x48xf32>
    %39 = arith.divf %37, %38 : vector<32x48xf32>
    %40 = arith.mulf %39, %34 : vector<32x48xf32>
    %cst_25 = arith.constant 0.000000e+00 : f32
    %41 = vector.broadcast %cst_25 : f32 to vector<32x48xf32>
    %42 = arith.maximumf %40, %41 : vector<32x48xf32>
    %43 = vector.extract_strided_slice %42 {offsets = [0, 0], sizes = [32, 16], strides = [1, 1]} : vector<32x48xf32> to vector<32x16xf32>
    %44 = vector.extract_strided_slice %42 {offsets = [0, 16], sizes = [32, 16], strides = [1, 1]} : vector<32x48xf32> to vector<32x16xf32>
    %45 = arith.addf %43, %44 : vector<32x16xf32>
    %46 = vector.extract_strided_slice %42 {offsets = [0, 32], sizes = [32, 16], strides = [1, 1]} : vector<32x48xf32> to vector<32x16xf32>
    %47 = arith.addf %45, %46 : vector<32x16xf32>
    %c0_26 = arith.constant 0 : index
    %c0_27 = arith.constant 0 : index
    %48 = vector.load %arg11[%c0_26, %c0_27] : memref<8x48xf32, #tpu.memory_space<vmem>>, vector<8x48xf32>
    %cst_28 = arith.constant dense<0.000000e+00> : vector<32x48xf32>
    %49 = tpu.matmul %1, %48, %cst_28 {dimension_numbers = #tpu.dot_dimension_numbers<[1], [0], [0], [1], [0, 0, 1, 1], [], []>} : vector<32x8xf32>, vector<8x48xf32>, vector<32x48xf32> -> vector<32x48xf32>
    %c0_29 = arith.constant 0 : index
    %c0_30 = arith.constant 0 : index
    %50 = vector.load %arg13[%c0_29, %c0_30] : memref<1x48xf32, #tpu.memory_space<vmem>>, vector<1x48xf32>
    %51 = vector.broadcast %50 : vector<1x48xf32> to vector<32x48xf32>
    %52 = arith.addf %49, %51 : vector<32x48xf32>
    %c0_31 = arith.constant 0 : index
    %c0_32 = arith.constant 0 : index
    %53 = vector.load %arg12[%c0_31, %c0_32] : memref<8x48xf32, #tpu.memory_space<vmem>>, vector<8x48xf32>
    %cst_33 = arith.constant dense<0.000000e+00> : vector<32x48xf32>
    %54 = tpu.matmul %1, %53, %cst_33 {dimension_numbers = #tpu.dot_dimension_numbers<[1], [0], [0], [1], [0, 0, 1, 1], [], []>} : vector<32x8xf32>, vector<8x48xf32>, vector<32x48xf32> -> vector<32x48xf32>
    %c0_34 = arith.constant 0 : index
    %c0_35 = arith.constant 0 : index
    %55 = vector.load %arg14[%c0_34, %c0_35] : memref<1x48xf32, #tpu.memory_space<vmem>>, vector<1x48xf32>
    %56 = vector.broadcast %55 : vector<1x48xf32> to vector<32x48xf32>
    %57 = arith.addf %54, %56 : vector<32x48xf32>
    %58 = arith.negf %52 : vector<32x48xf32>
    %59 = math.exp %58 : vector<32x48xf32>
    %cst_36 = arith.constant 1.000000e+00 : f32
    %60 = vector.broadcast %cst_36 : f32 to vector<32x48xf32>
    %61 = arith.addf %60, %59 : vector<32x48xf32>
    %62 = arith.divf %60, %61 : vector<32x48xf32>
    %63 = arith.mulf %62, %57 : vector<32x48xf32>
    %cst_37 = arith.constant 0.000000e+00 : f32
    %64 = vector.broadcast %cst_37 : f32 to vector<32x48xf32>
    %65 = arith.maximumf %63, %64 : vector<32x48xf32>
    %66 = vector.extract_strided_slice %65 {offsets = [0, 0], sizes = [32, 16], strides = [1, 1]} : vector<32x48xf32> to vector<32x16xf32>
    %67 = vector.extract_strided_slice %65 {offsets = [0, 16], sizes = [32, 16], strides = [1, 1]} : vector<32x48xf32> to vector<32x16xf32>
    %68 = arith.addf %66, %67 : vector<32x16xf32>
    %69 = vector.extract_strided_slice %65 {offsets = [0, 32], sizes = [32, 16], strides = [1, 1]} : vector<32x48xf32> to vector<32x16xf32>
    %70 = arith.addf %68, %69 : vector<32x16xf32>
    %71 = arith.addf %47, %70 : vector<32x16xf32>
    %cst_38 = arith.constant 0.000000e+00 : f32
    %72 = vector.broadcast %cst_38 : f32 to vector<32x16xf32>
    %73 = arith.cmpf oge, %71, %72 : vector<32x16xf32>
    %cst_39 = arith.constant 0.00999999977 : f32
    %74 = vector.broadcast %cst_39 : f32 to vector<32x16xf32>
    %75 = arith.mulf %74, %71 : vector<32x16xf32>
    %76 = arith.select %73, %71, %75 : vector<32x16xi1>, vector<32x16xf32>
    %c0_40 = arith.constant 0 : index
    %c0_41 = arith.constant 0 : index
    %77 = vector.load %arg15[%c0_40, %c0_41] : memref<32x16xf32, #tpu.memory_space<vmem>>, vector<32x16xf32>
    tpu.vector_store %arg15[%c0_40, %c0_41], %76 {strides = array<i32>} : memref<32x16xf32, #tpu.memory_space<vmem>>, vector<32x16xf32>,
    return
  }
  func.func @transform_0(%arg0: i32) -> (i32, i32) {
    %c0_i32 = arith.constant 0 : i32
    %c0_i32_0 = arith.constant 0 : i32
    return %arg0, %c0_i32 : i32, i32
  }
  func.func @transform_1(%arg0: i32) -> (i32, i32) {
    %c0_i32 = arith.constant 0 : i32
    %c0_i32_0 = arith.constant 0 : i32
    return %arg0, %c0_i32 : i32, i32
  }
  func.func @transform_2(%arg0: i32) -> (i32, i32) {
    %c0_i32 = arith.constant 0 : i32
    %c0_i32_0 = arith.constant 0 : i32
    %c0_i32_1 = arith.constant 0 : i32
    return %c0_i32, %c0_i32_0 : i32, i32
  }
  func.func @transform_3(%arg0: i32) -> (i32, i32) {
    %c0_i32 = arith.constant 0 : i32
    %c0_i32_0 = arith.constant 0 : i32
    %c0_i32_1 = arith.constant 0 : i32
    return %c0_i32, %c0_i32_0 : i32, i32
  }
  func.func @transform_4(%arg0: i32) -> (i32, i32) {
    %c0_i32 = arith.constant 0 : i32
    %c0_i32_0 = arith.constant 0 : i32
    %c0_i32_1 = arith.constant 0 : i32
    return %c0_i32, %c0_i32_0 : i32, i32
  }
  func.func @transform_5(%arg0: i32) -> (i32, i32) {
    %c0_i32 = arith.constant 0 : i32
    %c0_i32_0 = arith.constant 0 : i32
    %c0_i32_1 = arith.constant 0 : i32
    return %c0_i32, %c0_i32_0 : i32, i32
  }
  func.func @transform_6(%arg0: i32) -> (i32, i32) {
    %c0_i32 = arith.constant 0 : i32
    %c0_i32_0 = arith.constant 0 : i32
    %c0_i32_1 = arith.constant 0 : i32
    return %c0_i32, %c0_i32_0 : i32, i32
  }
  func.func @transform_7(%arg0: i32) -> (i32, i32) {
    %c0_i32 = arith.constant 0 : i32
    %c0_i32_0 = arith.constant 0 : i32
    %c0_i32_1 = arith.constant 0 : i32
    return %c0_i32, %c0_i32_0 : i32, i32
  }
  func.func @transform_8(%arg0: i32) -> (i32, i32) {
    %c0_i32 = arith.constant 0 : i32
    %c0_i32_0 = arith.constant 0 : i32
    %c0_i32_1 = arith.constant 0 : i32
    return %c0_i32, %c0_i32_0 : i32, i32
  }
  func.func @transform_9(%arg0: i32) -> (i32, i32) {
    %c0_i32 = arith.constant 0 : i32
    %c0_i32_0 = arith.constant 0 : i32
    %c0_i32_1 = arith.constant 0 : i32
    return %c0_i32, %c0_i32_0 : i32, i32
  }
  func.func @transform_10(%arg0: i32) -> (i32, i32) {
    %c0_i32 = arith.constant 0 : i32
    %c0_i32_0 = arith.constant 0 : i32
    %c0_i32_1 = arith.constant 0 : i32
    return %c0_i32, %c0_i32_0 : i32, i32
  }
  func.func @transform_11(%arg0: i32) -> (i32, i32) {
    %c0_i32 = arith.constant 0 : i32
    %c0_i32_0 = arith.constant 0 : i32
    %c0_i32_1 = arith.constant 0 : i32
    return %c0_i32, %c0_i32_0 : i32, i32
  }
  func.func @transform_12(%arg0: i32) -> (i32, i32) {
    %c0_i32 = arith.constant 0 : i32
    %c0_i32_0 = arith.constant 0 : i32
    %c0_i32_1 = arith.constant 0 : i32
    return %c0_i32, %c0_i32_0 : i32, i32
  }
  func.func @transform_13(%arg0: i32) -> (i32, i32) {
    %c0_i32 = arith.constant 0 : i32
    %c0_i32_0 = arith.constant 0 : i32
    %c0_i32_1 = arith.constant 0 : i32
    return %c0_i32, %c0_i32_0 : i32, i32
  }
  func.func @transform_14(%arg0: i32) -> (i32, i32) {
    %c0_i32 = arith.constant 0 : i32
    %c0_i32_0 = arith.constant 0 : i32
    return %arg0, %c0_i32 : i32, i32
  }
}

</mosaic_0001>

<bundles_post_ra>
// kernel: tpu_custom_call.1
= control target key start
LH: loop header
LB: loop body
LE: loop exit
PB: predicated region body
PF: predicated region fallthrough
CT: control target
= control target key end

     0   :  { %s1393_s29 = smov 0   ;;  %s1621_s0 = inlined_call_operand.vmem [shape: f32[64,8], index: 0, kind: input, shape index: {}]   ;;  %s1622_s1 = inlined_call_operand.vmem [shape: f32[64,8], index: 1, kind: input, shape index: {}]   ;;  %s1623_s2 = inlined_call_operand.vmem [shape: f32[8,24], index: 2, kind: input, shape index: {}]   ;;  %s1624_s3 = inlined_call_operand.vmem [shape: f32[8,24], index: 3, kind: input, shape index: {}]   ;;  %s1625_s4 = inlined_call_operand.vmem [shape: f32[1,24], index: 4, kind: input, shape index: {}]   ;;  %s1626_s5 = inlined_call_operand.vmem [shape: f32[1,24], index: 5, kind: input, shape index: {}]   ;;  %s1627_s6 = inlined_call_operand.vmem [shape: f32[8,48], index: 6, kind: input, shape index: {}]   ;;  %s1628_s7 = inlined_call_operand.vmem [shape: f32[8,48], index: 7, kind: input, shape index: {}]   ;;  %s1629_s8 = inlined_call_operand.vmem [shape: f32[1,48], index: 8, kind: input, shape index: {}]   ;;  %s1630_s9 = inlined_call_operand.vmem [shape: f32[1,48], index: 9, kind: input, shape index: {}]   ;;  %s1631_s10 = inlined_call_operand.vmem [shape: f32[8,48], index: 10, kind: input, shape index: {}]   ;;  %s1632_s11 = inlined_call_operand.vmem [shape: f32[8,48], index: 11, kind: input, shape index: {}]   ;;  %s1633_s12 = inlined_call_operand.vmem [shape: f32[1,48], index: 12, kind: input, shape index: {}]   ;;  %s1634_s13 = inlined_call_operand.vmem [shape: f32[1,48], index: 13, kind: input, shape index: {}]   ;;  %s1635_s14 = inlined_call_operand.vmem [shape: f32[64,16], index: 14, kind: output, shape index: {}]  }
   0x1 LB: > { %s1191_s30 = sadd.s32 4294967295, %s1313_s29   ;;  %p1195_p0 = scmp.ge.s32.totalorder %s1313_s29, 1  ;;  %s1313_s29 = sphi %s1393_s29, %s24_s29  }
   0x2   : > { %p424_p1 = scmp.lt.s32.totalorder %s1313_s29, 3 }
   0x4   : > { %p425_p2 = pnand %p1195_p0, %p424_p1 }
   0x5   : > { %s1196_s17 = sshll.u32 (!%p425_p2), %s1191_s30, 2  ;;  %s1315_s21 = smov (!%p425_p2), 120  }
   0x6   : > { %428 = sbr.rel (%p425_p2) target bundleno = 622 (0x26e), region = 76  ;;  %p476_p3 = scmp.lt.s32.totalorder (!%p425_p2), %s1196_s17, 7 }
   0x7   : > { %s1316_s22 = smov (!%p425_p2), 112   ;;  %s1317_s16 = smov (!%p425_p2), 96  }
   0xb   : > { %v501_v0 = vld [vmem:[%s1623_s2] sm:$0xff]  ;;  %s1645_s17 = smov (!%p476_p3, %s1196_s17), 7  ;;  %vm506_vm0 = vcmask 64512  }
   0xc   : > { %v548_v1 = vld [vmem:[%s1624_s3] sm:$0xff]  ;;  %534 = vmatpush.msra.mxu0 %v501_v0  ;;  %1240 = vmatpush.msra.mxu2 %v501_v0  ;;  %s1407_s20 = sshll.u32 %s1645_s17, 3 }
   0xd   : > { %568 = vmatpush.msra.mxu1 %v548_v1  ;;  %1241 = vmatpush.msra.mxu3 %v548_v1  ;;  %s479_s23 = scalar_lea.vmem %s1621_s0, %s1407_s20  ;;  %s1425_s26 = scalar_lea.vmem %s1622_s1, %s1407_s20  ;;  %v902_v6 = vld [vmem:[%s1631_s10] sm:$0xff] }
   0xe   : > { %v493_v2 = vld [vmem:[%s479_s23] sm:$0xff]  ;;  %v495_v3 = vld [vmem:[%s479_s23 + $0x10] sm:$0xff]  ;;  %v494_v4 = vld [vmem:[%s479_s23 + $0x8] sm:$0xff]  ;;  %934 = vmatpush.msrb.mxu0 %v902_v6 }
   0xf   : > { %1202 = vmatmul.msk.f32.vlgmr.msra.gmra.mxu0 %vm506_vm0, %v493_v2  ;;  %1204 = vmatmul.msk.f32.vlgmr.msra.gmra.mxu2 %vm506_vm0, %v495_v3  ;;  %v496_v5 = vld [vmem:[%s479_s23 + $0x18] sm:$0xff]  ;;  %v497_v7 = vld [vmem:[%s1425_s26] sm:$0xff]  ;;  %v498_v12 = vld [vmem:[%s1425_s26 + $0x8] sm:$0xff] }
  0x10   : > { %1206 = vmatmul.msk.f32.vlgmr.msra.gmra.mxu1 %vm506_vm0, %v493_v2  ;;  %1208 = vmatmul.msk.f32.vlgmr.msra.gmra.mxu3 %vm506_vm0, %v495_v3  ;;  %v1253_v8 = vld [vmem:[%s1625_s4] ss:$0 sm:$0xff]  ;;  %v1438_v21 = vld [vmem:[%s1425_s26 + $0x10] sm:$0xff]  ;;  %v1447_v29 = vld [vmem:[%s1425_s26 + $0x18] sm:$0xff] }
  0x11   : > { %v948_v26 = vld [vmem:[%s1632_s11] sm:$0xff] }
  0x12   : > { %968 = vmatpush.msrb.mxu1 %v948_v26  ;;  %v1452_v34 = vld [vmem:[%s1626_s5] ss:$0 sm:$0xff] }
  0x17   : > { %1203 = vmatmul.msk.f32.gmra.mxu0 %vm506_vm0, %v494_v4  ;;  %1205 = vmatmul.msk.f32.gmra.mxu2 %vm506_vm0, %v496_v5 }
  0x18   : > { %1207 = vmatmul.msk.f32.gmra.mxu1 %vm506_vm0, %v494_v4  ;;  %1209 = vmatmul.msk.f32.gmra.mxu3 %vm506_vm0, %v496_v5 }
  0x1f   : > { %1226 = vmatmul.msk.f32.vlgmr.msrb.gmra.mxu0 %vm506_vm0, %v497_v7 }
  0x20   : > { %1230 = vmatmul.msk.f32.vlgmr.msrb.gmra.mxu1 %vm506_vm0, %v497_v7 }
  0x27   : > { %1227 = vmatmul.msk.f32.gmra.mxu0 %vm506_vm0, %v498_v12 }
  0x28   : > { %1231 = vmatmul.msk.f32.gmra.mxu1 %vm506_vm0, %v498_v12 }
  0x2f   : > { %1228 = vmatmul.msk.f32.gmra.mxu0 %vm506_vm0, %v1438_v21 }
  0x30   : > { %1232 = vmatmul.msk.f32.gmra.mxu1 %vm506_vm0, %v1438_v21 }
  0x37   : > { %1229 = vmatmul.msk.f32.gmra.mxu0 %vm506_vm0, %v1447_v29 }
  0x38   : > { %1233 = vmatmul.msk.f32.gmra.mxu1 %vm506_vm0, %v1447_v29  ;;  %v1255_v29 = vld [vmem:[%s1633_s12] ss:$0 sm:$0xff] }
  0x8c   : > { %v536_v9 = vpop.f32.mrf.mxu0 }
  0x8d   : > { %v537_v10 = vadd.f32 %v1253_v8, %v536_v9  ;;  %v570_v32 = vpop.f32.mrf.mxu1 }
  0x8e   : > { %v571_v42 = vadd.f32 %v1452_v34, %v570_v32 }
  0x8f   : > { %v1210_v11 = vmul.f32 -1.442695, %v537_v10 }
  0x91   : > { %1259 = vpow2.f32 %v1210_v11 }
  0x92   : > { %v542_v13 = vpop.f32.mrf.mxu2 }
  0x93   : > { %v543_v14 = vadd.f32 %v1253_v8, %v542_v13  ;;  %v576_v50 = vpop.f32.mrf.mxu3 }
  0x94   : > { %v539_v15 = vpop.f32.mrf.mxu0  ;;  %v577_v60 = vadd.f32 %v1452_v34, %v576_v50  ;;  %v1527_v50 = vld [vmem:[%s1634_s13] ss:$0 sm:$0xff] }
  0x95   : > { %v1212_v16 = vmul.f32 -1.442695, %v543_v14  ;;  %v540_v17 = vadd.f32 %v1253_v8, %v539_v15  ;;  %v573_v57 = vpop.f32.mrf.mxu1 }
  0x96   : > { %v574_v4 = vadd.f32 %v1452_v34, %v573_v57 }
  0x97   : > { %v1260_v18 = vpop.eup %1259  ;;  %1261 = vpow2.f32 %v1212_v16  ;;  %v1211_v19 = vmul.f32 -1.442695, %v540_v17 }
  0x98   : > { %v594_v20 = vadd.f32 1.0, %v1260_v18 }
  0x99   : > { %1263 = vpow2.f32 %v1211_v19 }
  0x9a   : > { %1265 = vrcp.f32 %v594_v20  ;;  %v545_v22 = vpop.f32.mrf.mxu2  ;;  %v607_v36 = vand.u32 2147483647, %v594_v20  ;;  %v609_v37 = vand.u32 2147483648, %v594_v20  ;;  %vm603_vm2 = vweird.f32 %v594_v20 }
  0x9b   : > { %v546_v23 = vadd.f32 %v1253_v8, %v545_v22  ;;  %v579_v17 = vpop.f32.mrf.mxu3 }
  0x9c   : > { %vm608_vm3 = vcmp.eq.f32.partialorder %v607_v36, 8.507059e+37  ;;  %v610_v44 = vor.u32 1.1754944e-38, %v609_v37 }
  0x9d   : > { %v1262_v24 = vpop.eup %1261  ;;  %v1213_v25 = vmul.f32 -1.442695, %v546_v23  ;;  %v580_v23 = vadd.f32 %v1452_v34, %v579_v17  ;;  %v748_v34 = vld [vmem:[%s1628_s7] sm:$0xff] }
  0x9e   : > { %v596_v27 = vadd.f32 1.0, %v1262_v24  ;;  %768 = vmatpush.msrb.mxu3 %v748_v34 }
  0x9f   : > { %v1264_v28 = vpop.eup %1263  ;;  %1267 = vpow2.f32 %v1213_v25 }
  0xa0   : > { %v1266_v30 = vpop.eup %1265  ;;  %1269 = vrcp.f32 %v596_v27  ;;  %v595_v31 = vadd.f32 1.0, %v1264_v28  ;;  %vm633_vm5 = vweird.f32 %v596_v27  ;;  %v637_v47 = vand.u32 2147483647, %v596_v27 }
  0xa1   : > { %v599_v33 = vmul.f32 %v1266_v30, %v594_v20  ;;  %vm604_vm1 = vweird.f32 %v1266_v30  ;;  %v639_v48 = vand.u32 2147483648, %v596_v27 }
  0xa2   : > { %1271 = vrcp.f32 %v595_v31  ;;  %vm605_vm4 = vmor %vm603_vm2, %vm604_vm1  ;;  %v622_v54 = vand.u32 2147483647, %v595_v31  ;;  %v624_v59 = vand.u32 2147483648, %v595_v31  ;;  %vm1467_vm8 = vcmp.eq.f32.partialorder %v637_v47, 8.507059e+37 }
  0xa3   : > { %v600_v35 = vsub.f32 1.0, %v599_v33  ;;  %v640_v63 = vor.u32 1.1754944e-38, %v639_v48  ;;  %vm618_vm10 = vweird.f32 %v595_v31 }
  0xa4   : > { %vm1474_vm11 = vcmp.eq.f32.partialorder %v622_v54, 8.507059e+37  ;;  %v625_v8 = vor.u32 1.1754944e-38, %v624_v59 }
  0xa5   : > { %v1268_v38 = vpop.eup %1267  ;;  %v601_v39 = vmul.f32 %v1266_v30, %v600_v35 }
  0xa6   : > { %v1270_v40 = vpop.eup %1269  ;;  %v1456_v41 = vadd.f32 1.0, %v1268_v38 }
  0xa7   : > { %v602_v43 = vadd.f32 %v1266_v30, %v601_v39  ;;  %v629_v45 = vmul.f32 %v1270_v40, %v596_v27  ;;  %vm634_vm6 = vweird.f32 %v1270_v40 }
  0xa8   : > { %v1272_v46 = vpop.eup %1271  ;;  %1273 = vrcp.f32 %v1456_v41  ;;  %vm1463_vm7 = vmor %vm633_vm5, %vm634_vm6  ;;  %vm648_vm13 = vweird.f32 %v1456_v41  ;;  %v652_v11 = vand.u32 2147483647, %v1456_v41  ;;  %v654_v12 = vand.u32 2147483648, %v1456_v41 }
  0xa9   : > { %v606_v49 = vsel %vm605_vm4, %v1266_v30, %v602_v43  ;;  %v630_v51 = vsub.f32 1.0, %v629_v45  ;;  %v614_v52 = vmul.f32 %v1272_v46, %v595_v31  ;;  %vm619_vm9 = vweird.f32 %v1272_v46  ;;  %v702_v30 = vld [vmem:[%s1627_s6] sm:$0xff]  ;;  %v936_v31 = vpop.f32.mrf.mxu0 }
  0xaa   : > { %v611_v53 = vsel %vm608_vm3, %v610_v44, %v606_v49  ;;  %vm620_vm12 = vmor %vm618_vm10, %vm619_vm9  ;;  %v655_v21 = vor.u32 1.1754944e-38, %v654_v12  ;;  %vm653_vm1 = vcmp.eq.f32.partialorder %v652_v11, 8.507059e+37  ;;  %734 = vmatpush.msrb.mxu2 %v702_v30  ;;  %v937_v32 = vadd.f32 %v1255_v29, %v936_v31 }
  0xab   : > { %v658_v55 = vmul.f32 %v611_v53, %v571_v42  ;;  %v631_v56 = vmul.f32 %v1270_v40, %v630_v51  ;;  %v615_v58 = vsub.f32 1.0, %v614_v52  ;;  %v970_v51 = vpop.f32.mrf.mxu1 }
  0xac   : > { %v1234_v33 = vmul.f32 -1.442695, %v937_v32 }
  0xad   : > { %v1471_v0 = vmax.f32 %v658_v55, 0.0  ;;  %v632_v1 = vadd.f32 %v1270_v40, %v631_v56  ;;  %v616_v2 = vmul.f32 %v1272_v46, %v615_v58  ;;  %v971_v55 = vadd.f32 %v1527_v50, %v970_v51 }
  0xae   : > { %v1274_v3 = vpop.eup %1273  ;;  %1275 = vpow2.f32 %v1234_v33 }
  0xaf   : > { %v636_v6 = vsel %vm1463_vm7, %v1270_v40, %v632_v1  ;;  %670 = vrot.lane.b32.xlu0 %v1471_v0, %s1315_s21  ;;  %v617_v7 = vadd.f32 %v1272_v46, %v616_v2  ;;  %v644_v9 = vmul.f32 %v1274_v3, %v1456_v41  ;;  %vm649_vm14 = vweird.f32 %v1274_v3 }
  0xb0   : > { %v641_v10 = vsel %vm1467_vm8, %v640_v63, %v636_v6  ;;  %vm650_vm15 = vmor %vm648_vm13, %vm649_vm14 }
  0xb1   : > { %v660_v13 = vmul.f32 %v641_v10, %v577_v60  ;;  %v621_v14 = vsel %vm620_vm12, %v1272_v46, %v617_v7  ;;  %v645_v15 = vsub.f32 1.0, %v644_v9  ;;  %v939_v37 = vpop.f32.mrf.mxu0 }
  0xb2   : > { %v626_v16 = vsel %vm1474_vm11, %v625_v8, %v621_v14  ;;  %v940_v38 = vadd.f32 %v1255_v29, %v939_v37 }
  0xb3   : > { %v1492_v18 = vmax.f32 %v660_v13, 0.0  ;;  %v659_v19 = vmul.f32 %v626_v16, %v574_v4  ;;  %v646_v20 = vmul.f32 %v1274_v3, %v645_v15  ;;  %v973_v4 = vpop.f32.mrf.mxu1 }
  0xb4   : > { %v1276_v35 = vpop.eup %1275  ;;  %v1235_v39 = vmul.f32 -1.442695, %v940_v38  ;;  %v974_v17 = vadd.f32 %v1527_v50, %v973_v4 }
  0xb5   : > { %v1494_v22 = vmax.f32 %v659_v19, 0.0  ;;  %674 = vrot.lane.b32.xlu2 %v1492_v18, %s1315_s21  ;;  %v647_v24 = vadd.f32 %v1274_v3, %v646_v20  ;;  %v994_v36 = vadd.f32 1.0, %v1276_v35 }
  0xb7   : > { %672 = vrot.lane.b32.xlu1 %v1494_v22, %s1315_s21  ;;  %686 = vrot.lane.b32.xlu0 %v1471_v0, %s1316_s22  ;;  %v651_v25 = vsel %vm650_vm15, %v1274_v3, %v647_v24  ;;  %1277 = vrcp.f32 %v994_v36  ;;  %v1009_v49 = vand.u32 2147483648, %v994_v36  ;;  %vm1003_vm2 = vweird.f32 %v994_v36 }
  0xb8   : > { %v656_v26 = vsel %vm653_vm1, %v655_v21, %v651_v25  ;;  %1279 = vpow2.f32 %v1235_v39  ;;  %v1007_v53 = vand.u32 2147483647, %v994_v36 }
  0xb9   : > { %v661_v27 = vmul.f32 %v656_v26, %v580_v23  ;;  %v942_v42 = vpop.f32.mrf.mxu0  ;;  %v1010_v54 = vor.u32 1.1754944e-38, %v1009_v49 }
  0xba   : > { %v943_v43 = vadd.f32 %v1255_v29, %v942_v42  ;;  %vm1008_vm5 = vcmp.eq.f32.partialorder %v1007_v53, 8.507059e+37 }
  0xbb   : > { %v1505_v28 = vmax.f32 %v661_v27, 0.0  ;;  %v976_v26 = vpop.f32.mrf.mxu1 }
  0xbc   : > { %v1236_v46 = vmul.f32 -1.442695, %v943_v43  ;;  %v977_v38 = vadd.f32 %v1527_v50, %v976_v26 }
  0xbd   : > { %690 = vrot.lane.b32.xlu2 %v1492_v18, %s1316_s22  ;;  %v1278_v40 = vpop.eup %1277 }
  0xbe   : > { %v999_v41 = vmul.f32 %v1278_v40, %v994_v36  ;;  %v1280_v45 = vpop.eup %1279  ;;  %1281 = vpow2.f32 %v1236_v46  ;;  %vm1004_vm3 = vweird.f32 %v1278_v40 }
  0xbf   : > { %688 = vrot.lane.b32.xlu1 %v1494_v22, %s1316_s22  ;;  %676 = vrot.lane.b32.xlu0 %v1505_v28, %s1315_s21  ;;  %v995_v48 = vadd.f32 1.0, %v1280_v45  ;;  %vm1005_vm4 = vmor %vm1003_vm2, %vm1004_vm3 }
  0xc0   : > { %v1000_v44 = vsub.f32 1.0, %v999_v41 }
  0xc1   : > { %1283 = vrcp.f32 %v995_v48  ;;  %v945_v57 = vpop.f32.mrf.mxu0  ;;  %v1024_v6 = vand.u32 2147483648, %v995_v48  ;;  %vm1018_vm6 = vweird.f32 %v995_v48  ;;  %v1022_v8 = vand.u32 2147483647, %v995_v48 }
  0xc2   : > { %v1001_v47 = vmul.f32 %v1278_v40, %v1000_v44  ;;  %v946_v59 = vadd.f32 %v1255_v29, %v945_v57 }
  0xc3   : > { %v1025_v14 = vor.u32 1.1754944e-38, %v1024_v6  ;;  %vm1023_vm9 = vcmp.eq.f32.partialorder %v1022_v8, 8.507059e+37 }
  0xc4   : > { %v1002_v52 = vadd.f32 %v1278_v40, %v1001_v47  ;;  %v1282_v62 = vpop.eup %1281  ;;  %v1237_v63 = vmul.f32 -1.442695, %v946_v59 }
  0xc5   : > { %v996_v2 = vadd.f32 1.0, %v1282_v62 }
  0xc6   : > { %v1006_v56 = vsel %vm1005_vm4, %v1278_v40, %v1002_v52  ;;  %1285 = vpow2.f32 %v1237_v63 }
  0xc7   : > { %692 = vrot.lane.b32.xlu1 %v1505_v28, %s1316_s22  ;;  %v1011_v58 = vsel %vm1008_vm5, %v1010_v54, %v1006_v56  ;;  %v1284_v1 = vpop.eup %1283  ;;  %1287 = vrcp.f32 %v996_v2  ;;  %vm1033_vm10 = vweird.f32 %v996_v2  ;;  %v1039_v27 = vand.u32 2147483648, %v996_v2 }
  0xc8   : > { %v1058_v61 = vmul.f32 %v1011_v58, %v971_v55  ;;  %v1014_v5 = vmul.f32 %v1284_v1, %v995_v48  ;;  %vm1019_vm7 = vweird.f32 %v1284_v1  ;;  %v1037_v31 = vand.u32 2147483647, %v996_v2  ;;  %v979_v48 = vpop.f32.mrf.mxu1 }
  0xc9   : > { %vm1535_vm8 = vmor %vm1018_vm6, %vm1019_vm7  ;;  %v1040_v36 = vor.u32 1.1754944e-38, %v1039_v27  ;;  %v980_v55 = vadd.f32 %v1527_v50, %v979_v48  ;;  %v1257_v50 = vld [vmem:[%s1629_s8] ss:$0 sm:$0xff] }
  0xca   : > { %v1530_v3 = vmax.f32 %v1058_v61, 0.0  ;;  %v1015_v7 = vsub.f32 1.0, %v1014_v5  ;;  %vm1038_vm13 = vcmp.eq.f32.partialorder %v1037_v31, 8.507059e+37 }
  0xcc   : > { %1070 = vrot.lane.b32.xlu0 %v1530_v3, %s1316_s22  ;;  %v1016_v10 = vmul.f32 %v1284_v1, %v1015_v7  ;;  %v1286_v15 = vpop.eup %1285 }
  0xcd   : > { %v1288_v20 = vpop.eup %1287  ;;  %v997_v21 = vadd.f32 1.0, %v1286_v15 }
  0xce   : > { %v1017_v19 = vadd.f32 %v1284_v1, %v1016_v10  ;;  %v1029_v23 = vmul.f32 %v1288_v20, %v996_v2  ;;  %vm1034_vm11 = vweird.f32 %v1288_v20 }
  0xcf   : > { %1289 = vrcp.f32 %v997_v21  ;;  %vm1035_vm12 = vmor %vm1033_vm10, %vm1034_vm11  ;;  %vm1048_vm14 = vweird.f32 %v997_v21  ;;  %v1054_v43 = vand.u32 2147483648, %v997_v21  ;;  %v1052_v46 = vand.u32 2147483647, %v997_v21 }
  0xd0   : > { %v1030_v29 = vsub.f32 1.0, %v1029_v23 }
  0xd1   : > { %v1055_v53 = vor.u32 1.1754944e-38, %v1054_v43  ;;  %vm1053_vm2 = vcmp.eq.f32.partialorder %v1052_v46, 8.507059e+37 }
  0xd2   : > { %v1031_v34 = vmul.f32 %v1288_v20, %v1030_v29 }
  0xd4   : > { %1086 = vrot.lane.b32.xlu0 %v1530_v3, %s1317_s16  ;;  %v1032_v39 = vadd.f32 %v1288_v20, %v1031_v34 }
  0xd5   : > { %v1290_v40 = vpop.eup %1289 }
  0xd6   : > { %v1044_v41 = vmul.f32 %v1290_v40, %v997_v21  ;;  %vm1049_vm15 = vweird.f32 %v1290_v40 }
  0xd7   : > { %vm1050_vm1 = vmor %vm1048_vm14, %vm1049_vm15 }
  0xd8   : > { %v1045_v45 = vsub.f32 1.0, %v1044_v41 }
  0xda   : > { %v1046_v52 = vmul.f32 %v1290_v40, %v1045_v45 }
  0xdc   : > { %v1047_v56 = vadd.f32 %v1290_v40, %v1046_v52 }
  0xde   : > { %v1051_v57 = vsel %vm1050_vm1, %v1290_v40, %v1047_v56 }
 0x10f   : > { %v675_v24 = vpop.permute.xlu2 %674 }
 0x110   : > { %v684_v49 = vadd.f32 %v675_v24, %v1492_v18  ;;  %v1056_v18 = vsel %vm1053_vm2, %v1055_v53, %v1051_v57 }
 0x111   : > { %v1061_v59 = vmul.f32 %v1056_v18, %v980_v55 }
 0x113   : > { %v1565_v62 = vmax.f32 %v1061_v59, 0.0 }
 0x115   : > { %1076 = vrot.lane.b32.xlu0 %v1565_v62, %s1316_s22 }
 0x117   : > { %v691_v47 = vpop.permute.xlu2 %690 }
 0x118   : > { %v700_v54 = vadd.f32 %v691_v47, %v684_v49 }
 0x121   : > { %v671_v60 = vpop.permute.xlu0 %670 }
 0x122   : > { %v682_v9 = vadd.f32 %v671_v60, %v1471_v0  ;;  %v1021_v0 = vsel %vm1535_vm8, %v1284_v1, %v1017_v19  ;;  %v1577_v19 = vld [vmem:[%s1630_s9] ss:$0 sm:$0xff] }
 0x123   : > { %v1026_v25 = vsel %vm1023_vm9, %v1025_v14, %v1021_v0 }
 0x124   : > { %v1059_v30 = vmul.f32 %v1026_v25, %v974_v17 }
 0x126   : > { %v1547_v33 = vmax.f32 %v1059_v30, 0.0 }
 0x128   : > { %1088 = vrot.lane.b32.xlu1 %v1547_v33, %s1317_s16  ;;  %1072 = vrot.lane.b32.xlu2 %v1547_v33, %s1316_s22 }
 0x129   : > { %v673_v11 = vpop.permute.xlu1 %672  ;;  %v687_v12 = vpop.permute.xlu0 %686 }
 0x12a   : > { %v698_v16 = vadd.f32 %v687_v12, %v682_v9  ;;  %v683_v32 = vadd.f32 %v673_v11, %v1494_v22  ;;  %v1036_v22 = vsel %vm1035_vm12, %v1288_v20, %v1032_v39 }
 0x12b   : > { %v1041_v42 = vsel %vm1038_vm13, %v1040_v36, %v1036_v22 }
 0x12c   : > { %1214 = vmatmul.msk.f32.vlgmr.msrb.gmra.mxu2 %vm506_vm0, %v698_v16  ;;  %1218 = vmatmul.msk.f32.vlgmr.msrb.gmra.mxu3 %vm506_vm0, %v698_v16  ;;  %v1060_v44 = vmul.f32 %v1041_v42, %v977_v38 }
 0x12e   : > { %v1557_v51 = vmax.f32 %v1060_v44, 0.0 }
 0x130   : > { %1074 = vrot.lane.b32.xlu2 %v1557_v51, %s1316_s22 }
 0x131   : > { %v689_v35 = vpop.permute.xlu1 %688  ;;  %v677_v58 = vpop.permute.xlu0 %676 }
 0x132   : > { %v699_v37 = vadd.f32 %v689_v35, %v683_v32  ;;  %v685_v61 = vadd.f32 %v677_v58, %v1505_v28 }
 0x134   : > { %1215 = vmatmul.msk.f32.gmra.mxu2 %vm506_vm0, %v699_v37  ;;  %1219 = vmatmul.msk.f32.gmra.mxu3 %vm506_vm0, %v699_v37 }
 0x139   : > { %v693_v60 = vpop.permute.xlu1 %692 }
 0x13a   : > { %v701_v63 = vadd.f32 %v693_v60, %v685_v61 }
 0x13c   : > { %1216 = vmatmul.msk.f32.gmra.mxu2 %vm506_vm0, %v700_v54  ;;  %1220 = vmatmul.msk.f32.gmra.mxu3 %vm506_vm0, %v700_v54 }
 0x144   : > { %1217 = vmatmul.msk.f32.gmra.mxu2 %vm506_vm0, %v701_v63  ;;  %1221 = vmatmul.msk.f32.gmra.mxu3 %vm506_vm0, %v701_v63 }
 0x1af   : > { %v736_v1 = vpop.f32.mrf.mxu2  ;;  %v770_v14 = vpop.f32.mrf.mxu3 }
 0x1b0   : > { %v737_v2 = vadd.f32 %v1257_v50, %v736_v1  ;;  %v771_v29 = vadd.f32 %v1577_v19, %v770_v14 }
 0x1b2   : > { %v1222_v4 = vmul.f32 -1.442695, %v737_v2 }
 0x1b4   : > { %1291 = vpow2.f32 %v1222_v4 }
 0x1b7   : > { %v739_v5 = vpop.f32.mrf.mxu2  ;;  %v773_v37 = vpop.f32.mrf.mxu3 }
 0x1b8   : > { %v740_v28 = vadd.f32 %v1257_v50, %v739_v5  ;;  %v774_v48 = vadd.f32 %v1577_v19, %v773_v37 }
 0x1ba   : > { %v1292_v6 = vpop.eup %1291  ;;  %v1223_v7 = vmul.f32 -1.442695, %v740_v28 }
 0x1bb   : > { %v794_v8 = vadd.f32 1.0, %v1292_v6 }
 0x1bc   : > { %1293 = vpow2.f32 %v1223_v7 }
 0x1bd   : > { %1295 = vrcp.f32 %v794_v8  ;;  %v809_v20 = vand.u32 2147483648, %v794_v8  ;;  %v807_v23 = vand.u32 2147483647, %v794_v8  ;;  %vm803_vm3 = vweird.f32 %v794_v8 }
 0x1bf   : > { %v742_v9 = vpop.f32.mrf.mxu2  ;;  %v810_v31 = vor.u32 1.1754944e-38, %v809_v20  ;;  %vm808_vm5 = vcmp.eq.f32.partialorder %v807_v23, 8.507059e+37  ;;  %v776_v56 = vpop.f32.mrf.mxu3 }
 0x1c0   : > { %v743_v10 = vadd.f32 %v1257_v50, %v742_v9  ;;  %v1073_v20 = vpop.permute.xlu2 %1072 }
 0x1c2   : > { %v1294_v11 = vpop.eup %1293  ;;  %v1224_v12 = vmul.f32 -1.442695, %v743_v10 }
 0x1c3   : > { %v1296_v13 = vpop.eup %1295  ;;  %v795_v15 = vadd.f32 1.0, %v1294_v11 }
 0x1c4   : > { %v799_v16 = vmul.f32 %v1296_v13, %v794_v8  ;;  %1297 = vpow2.f32 %v1224_v12  ;;  %vm804_vm0 = vweird.f32 %v1296_v13 }
 0x1c5   : > { %1299 = vrcp.f32 %v795_v15  ;;  %vm805_vm4 = vmor %vm803_vm3, %vm804_vm0  ;;  %v824_v40 = vand.u32 2147483648, %v795_v15  ;;  %v822_v42 = vand.u32 2147483647, %v795_v15  ;;  %vm818_vm7 = vweird.f32 %v795_v15 }
 0x1c6   : > { %v800_v17 = vsub.f32 1.0, %v799_v16  ;;  %vm1118_vm0 = vcmask 130048  }
 0x1c7   : > { %v745_v21 = vpop.f32.mrf.mxu2  ;;  %v825_v46 = vor.u32 1.1754944e-38, %v824_v40  ;;  %vm823_vm9 = vcmp.eq.f32.partialorder %v822_v42, 8.507059e+37  ;;  %v779_v10 = vpop.f32.mrf.mxu3 }
 0x1c8   : > { %v801_v0 = vmul.f32 %v1296_v13, %v800_v17  ;;  %v746_v24 = vadd.f32 %v1257_v50, %v745_v21  ;;  %v777_v50 = vadd.f32 %v1577_v19, %v776_v56  ;;  %v1071_v21 = vpop.permute.xlu0 %1070 }
 0x1ca   : > { %v1298_v25 = vpop.eup %1297  ;;  %v802_v26 = vadd.f32 %v1296_v13, %v801_v0  ;;  %v1225_v27 = vmul.f32 -1.442695, %v746_v24  ;;  %v1075_v0 = vpop.permute.xlu2 %1074  ;;  %v1082_v24 = vadd.f32 %v1071_v21, %v1530_v3 }
 0x1cb   : > { %v1300_v30 = vpop.eup %1299  ;;  %v796_v32 = vadd.f32 1.0, %v1298_v25 }
 0x1cc   : > { %v806_v34 = vsel %vm805_vm4, %v1296_v13, %v802_v26  ;;  %v814_v35 = vmul.f32 %v1300_v30, %v795_v15  ;;  %1301 = vpow2.f32 %v1225_v27  ;;  %vm819_vm6 = vweird.f32 %v1300_v30 }
 0x1cd   : > { %v811_v36 = vsel %vm808_vm5, %v810_v31, %v806_v34  ;;  %1303 = vrcp.f32 %v796_v32  ;;  %vm820_vm8 = vmor %vm818_vm7, %vm819_vm6  ;;  %v839_v57 = vand.u32 2147483648, %v796_v32  ;;  %v837_v59 = vand.u32 2147483647, %v796_v32 }
 0x1ce   : > { %v858_v38 = vmul.f32 %v811_v36, %v771_v29  ;;  %v815_v39 = vsub.f32 1.0, %v814_v35  ;;  %vm833_vm11 = vweird.f32 %v796_v32  ;;  %v780_v13 = vadd.f32 %v1577_v19, %v779_v10  ;;  %v1089_v19 = vpop.permute.xlu1 %1088 }
 0x1cf   : > { %v840_v63 = vor.u32 1.1754944e-38, %v839_v57  ;;  %vm838_vm13 = vcmp.eq.f32.partialorder %v837_v59, 8.507059e+37  ;;  %v1083_v34 = vadd.f32 %v1073_v20, %v1547_v33  ;;  %v1084_v33 = vadd.f32 %v1075_v0, %v1557_v51 }
 0x1d0   : > { %v1580_v22 = vmax.f32 %v858_v38, 0.0  ;;  %v816_v41 = vmul.f32 %v1300_v30, %v815_v39  ;;  %v1087_v25 = vpop.permute.xlu0 %1086 }
 0x1d1   : > { %v1099_v39 = vadd.f32 %v1089_v19, %v1083_v34 }
 0x1d2   : > { %v1302_v43 = vpop.eup %1301  ;;  %v817_v44 = vadd.f32 %v1300_v30, %v816_v41  ;;  %886 = vrot.lane.b32.xlu1 %v1580_v22, %s1317_s16  ;;  %870 = vrot.lane.b32.xlu2 %v1580_v22, %s1316_s22 }
 0x1d3   : > { %v1304_v45 = vpop.eup %1303  ;;  %v797_v47 = vadd.f32 1.0, %v1302_v43 }
 0x1d4   : > { %v821_v49 = vsel %vm820_vm8, %v1300_v30, %v817_v44  ;;  %v829_v52 = vmul.f32 %v1304_v45, %v796_v32  ;;  %vm834_vm10 = vweird.f32 %v1304_v45  ;;  %v1098_v30 = vadd.f32 %v1087_v25, %v1082_v24 }
 0x1d5   : > { %v826_v53 = vsel %vm823_vm9, %v825_v46, %v821_v49  ;;  %1305 = vrcp.f32 %v797_v47  ;;  %vm835_vm12 = vmor %vm833_vm11, %vm834_vm10  ;;  %v854_v6 = vand.u32 2147483648, %v797_v47  ;;  %v852_v9 = vand.u32 2147483647, %v797_v47 }
 0x1d6   : > { %v859_v54 = vmul.f32 %v826_v53, %v774_v48  ;;  %v830_v55 = vsub.f32 1.0, %v829_v52  ;;  %vm848_vm15 = vweird.f32 %v797_v47 }
 0x1d7   : > { %v855_v12 = vor.u32 1.1754944e-38, %v854_v6  ;;  %vm853_vm2 = vcmp.eq.f32.partialorder %v852_v9, 8.507059e+37 }
 0x1d8   : > { %v863_v58 = vmax.f32 %v859_v54, 0.0  ;;  %v831_v18 = vmul.f32 %v1304_v45, %v830_v55  ;;  %v1077_v35 = vpop.permute.xlu0 %1076 }
 0x1d9   : > { %v1085_v56 = vadd.f32 %v1077_v35, %v1565_v62 }
 0x1da   : > { %v832_v60 = vadd.f32 %v1304_v45, %v831_v18  ;;  %872 = vrot.lane.b32.xlu1 %v863_v58, %s1316_s22  ;;  %888 = vrot.lane.b32.xlu2 %v863_v58, %s1317_s16 }
 0x1db   : > { %v1306_v61 = vpop.eup %1305 }
 0x1dc   : > { %v836_v1 = vsel %vm835_vm12, %v1304_v45, %v832_v60  ;;  %v844_v2 = vmul.f32 %v1306_v61, %v797_v47  ;;  %vm849_vm14 = vweird.f32 %v1306_v61 }
 0x1dd   : > { %v841_v4 = vsel %vm838_vm13, %v840_v63, %v836_v1  ;;  %vm850_vm1 = vmor %vm848_vm15, %vm849_vm14 }
 0x1de   : > { %v860_v5 = vmul.f32 %v841_v4, %v777_v50  ;;  %v845_v28 = vsub.f32 1.0, %v844_v2 }
 0x1e0   : > { %v864_v7 = vmax.f32 %v860_v5, 0.0  ;;  %v846_v8 = vmul.f32 %v1306_v61, %v845_v28 }
 0x1e2   : > { %v847_v11 = vadd.f32 %v1306_v61, %v846_v8  ;;  %874 = vrot.lane.b32.xlu0 %v864_v7, %s1316_s22  ;;  %890 = vrot.lane.b32.xlu2 %v864_v7, %s1317_s16 }
 0x1e4   : > { %v851_v14 = vsel %vm850_vm1, %v1306_v61, %v847_v11 }
 0x1e5   : > { %v856_v15 = vsel %vm853_vm2, %v855_v12, %v851_v14 }
 0x1e6   : > { %v861_v16 = vmul.f32 %v856_v15, %v780_v13 }
 0x1e8   : > { %v865_v17 = vmax.f32 %v861_v16, 0.0 }
 0x1ea   : > { %1090 = vrot.lane.b32.xlu0 %v1557_v51, %s1317_s16  ;;  %1092 = vrot.lane.b32.xlu2 %v1565_v62, %s1317_s16 }
 0x1eb   : > { %876 = vrot.lane.b32.xlu1 %v865_v17, %s1316_s22  ;;  %s1605_s22 = scalar_lea.vmem %s1635_s14, %s1407_s20 }
 0x1f3   : > { %892 = vrot.lane.b32.xlu1 %v865_v17, %s1317_s16 }
 0x22c   : > { %v871_v23 = vpop.permute.xlu2 %870 }
 0x22d   : > { %v882_v26 = vadd.f32 %v871_v23, %v1580_v22 }
 0x234   : > { %v889_v38 = vpop.permute.xlu2 %888 }
 0x23c   : > { %v891_v44 = vpop.permute.xlu2 %890 }
 0x244   : > { %v887_v27 = vpop.permute.xlu1 %886  ;;  %v1093_v54 = vpop.permute.xlu2 %1092 }
 0x245   : > { %v898_v29 = vadd.f32 %v887_v27, %v882_v26  ;;  %v1101_v18 = vadd.f32 %v1093_v54, %v1085_v56 }
 0x247   : > { %v1102_v31 = vadd.f32 %v1098_v30, %v898_v29 }
 0x249   : > { %vm1106_vm3 = vcmp.ge.f32.partialorder %v1102_v31, 0.0  ;;  %v1110_v32 = vmul.f32 0.01, %v1102_v31 }
 0x24b   : > { %v1114_v3 = vsel %vm1106_vm3, %v1102_v31, %v1110_v32 }
 0x24c   : > { %1119 = vst.msk [vmem:[%s1605_s22] sm:$0xff] %vm1118_vm0, %v1114_v3  ;;  %v873_v36 = vpop.permute.xlu1 %872 }
 0x24d   : > { %v883_v37 = vadd.f32 %v873_v36, %v863_v58 }
 0x24f   : > { %v899_v40 = vadd.f32 %v889_v38, %v883_v37 }
 0x251   : > { %v1103_v22 = vadd.f32 %v1099_v39, %v899_v40 }
 0x253   : > { %vm1107_vm4 = vcmp.ge.f32.partialorder %v1103_v22, 0.0  ;;  %v1111_v41 = vmul.f32 0.01, %v1103_v22 }
 0x254   : > { %v875_v42 = vpop.permute.xlu0 %874 }
 0x255   : > { %v1115_v43 = vsel %vm1107_vm4, %v1103_v22, %v1111_v41  ;;  %v884_v45 = vadd.f32 %v875_v42, %v864_v7 }
 0x256   : > { %1120 = vst.msk [vmem:[%s1605_s22 + $0x8] sm:$0xff] %vm1118_vm0, %v1115_v43 }
 0x257   : > { %v900_v47 = vadd.f32 %v891_v44, %v884_v45 }
 0x25c   : > { %v1091_v46 = vpop.permute.xlu0 %1090 }
 0x25d   : > { %v877_v48 = vpop.permute.xlu1 %876  ;;  %v1100_v49 = vadd.f32 %v1091_v46, %v1084_v33 }
 0x25e   : > { %v885_v57 = vadd.f32 %v877_v48, %v865_v17 }
 0x25f   : > { %v1104_v52 = vadd.f32 %v1100_v49, %v900_v47 }
 0x261   : > { %vm1108_vm5 = vcmp.ge.f32.partialorder %v1104_v52, 0.0  ;;  %v1112_v53 = vmul.f32 0.01, %v1104_v52 }
 0x263   : > { %v1116_v55 = vsel %vm1108_vm5, %v1104_v52, %v1112_v53 }
 0x264   : > { %1121 = vst.msk [vmem:[%s1605_s22 + $0x10] sm:$0xff] %vm1118_vm0, %v1116_v55 }
 0x265   : > { %v893_v58 = vpop.permute.xlu1 %892 }
 0x266   : > { %v901_v59 = vadd.f32 %v893_v58, %v885_v57 }
 0x268   : > { %v1105_v60 = vadd.f32 %v1101_v18, %v901_v59 }
 0x26a   : > { %vm1109_vm6 = vcmp.ge.f32.partialorder %v1105_v60, 0.0  ;;  %v1113_v51 = vmul.f32 0.01, %v1105_v60 }
 0x26c   : > { %v1117_v61 = vsel %vm1109_vm6, %v1105_v60, %v1113_v51 }
 0x26d   : > { %1122 = vst.msk [vmem:[%s1605_s22 + $0x18] sm:$0xff] %vm1118_vm0, %v1117_v61 }
 0x26e PF: > { %s24_s29 = sadd.s32 1, %s1313_s29  }
 0x26f   : > { %p21_p4 = scmp.ge.s32.totalorder %s24_s29, 4  }
 0x271   :  { %23 = sbr.rel (!%p21_p4) target bundleno = 1 (0x1), region = 109 }

</bundles_post_ra>
